<compile_context>
chip_gen: v7x
topology: tpu7x:2x2x1
jax: 0.10.0
libtpu: 0.0.40
codegen_flags: <defaults>
</compile_context>

<pallas_src>
import jax
import jax.numpy as jnp
from jax.experimental import pallas as pl
from jax.experimental.pallas import tpu as pltpu


def _mask_composite_kernel(img_ref, mask_ref, out_ref):
    """out = img * (1 - mask) + mask   (elementwise, VPU, lane-dense)."""
    img = img_ref[...]          # (1, C, T) tile
    m = mask_ref[...]           # (1, 1, T) tile -> broadcast over channel axis
    out_ref[...] = img * (1.0 - m) + m


def _pick_hw_tile(hw: int, c: int, dtype_bytes: int,
                  budget_bytes: int = 2 * 1024 * 1024) -> int:
    """Largest 128-multiple divisor of hw whose (c, tile) image slab fits the budget."""
    if hw % 128 != 0 or c * hw * dtype_bytes <= budget_bytes:
        return hw  # full plane (also required if hw is not 128-aligned)
    max_elems = max(128, budget_bytes // (c * dtype_bytes))
    tile = (max_elems // 128) * 128
    while tile >= 128:
        if hw % tile == 0:
            return tile
        tile -= 128
    return hw


def masked_images(images: jax.Array, masks: jax.Array) -> jax.Array:
    """Pallas kernel wrapper for `images * (1 - masks) + masks` (NCHW inputs)."""
    B, C, H, W = images.shape
    assert masks.shape == (B, 1, H, W)
    masks = masks.astype(images.dtype)          # matches `.float()` in the reference

    HW = H * W
    dtype_bytes = jnp.dtype(images.dtype).itemsize
    T = _pick_hw_tile(HW, C, dtype_bytes)

    # Lane-dense 3D views: last dim is the flattened spatial axis.
    img2 = images.reshape(B, C, HW)
    msk2 = masks.reshape(B, 1, HW)

    out = pl.pallas_call(
        _mask_composite_kernel,
        out_shape=jax.ShapeDtypeStruct((B, C, HW), images.dtype),
        grid=(B, HW // T),
        in_specs=[
            # full-channel image slab per grid step
            pl.BlockSpec((1, C, T), lambda b, t: (b, 0, t)),
            # single mask slab, broadcast over channels inside the kernel
            pl.BlockSpec((1, 1, T), lambda b, t: (b, 0, t)),
        ],
        out_specs=pl.BlockSpec((1, C, T), lambda b, t: (b, 0, t)),
        compiler_params=pltpu.CompilerParams(
            dimension_semantics=("parallel", "parallel")),
    )(img2, msk2)

    return out.reshape(B, C, H, W)


def inpainting_model_forward(images, masks, words_embs, sent_emb, text_mask):
    """JAX equivalent of InpaintingModel.forward."""
    images_masked = masked_images(images, masks)
    # TODO(synk): InpaintGenerator's definition is not included in the provided
    # source, so the generator pass (which consumes images_masked, words_embs,
    # sent_emb, text_mask) cannot be reproduced; the masked composite is returned.
    outputs = images_masked
    return outputs


if __name__ == "__main__":
    key = jax.random.PRNGKey(0)
    k_img, k_mask, k_we, k_se = jax.random.split(key, 4)

    B, C, H, W = 2, 3, 16, 16          # RGB images (Discriminator uses in_channels=3)
    L, E = 8, 32                       # small text sequence / embedding dims

    images = jax.random.uniform(k_img, (B, C, H, W), dtype=jnp.float32)
    masks = (jax.random.uniform(k_mask, (B, 1, H, W)) > 0.5).astype(jnp.float32)
    words_embs = jax.random.normal(k_we, (B, E, L), dtype=jnp.float32)   # unused (see TODO)
    sent_emb = jax.random.normal(k_se, (B, E), dtype=jnp.float32)        # unused (see TODO)
    text_mask = jnp.ones((B, L), dtype=jnp.float32)                      # unused (see TODO)

    out = inpainting_model_forward(images, masks, words_embs, sent_emb, text_mask)
    out = jax.block_until_ready(out)

    # sanity check against plain-JAX reference of the masking op
    ref = images * (1.0 - masks) + masks
    assert out.shape == (B, C, H, W)
    assert jnp.allclose(out, ref, atol=1e-6), "mismatch vs reference"

    print("KERNEL_OK")
</pallas_src>

<mosaic_0001>
module attributes {stable_mosaic.version = 11 : i64} {
  func.func @_mask_composite_kernel(%arg0: i32, %arg1: i32, %arg2: memref<1x3x256xf32, #tpu.memory_space<vmem>>, %arg3: memref<1x1x256xf32, #tpu.memory_space<vmem>>, %arg4: memref<1x3x256xf32, #tpu.memory_space<vmem>>) attributes {dimension_semantics = [#tpu.dimension_semantics<parallel>, #tpu.dimension_semantics<parallel>], iteration_bounds = array<i64: 2, 1>, scalar_prefetch = 0 : i64, scratch_operands = 0 : i64, tpu.core_type = #tpu.core_type<tc>, window_params = [{transform_indices = @transform_0, window_bounds = array<i64: 1, 3, 256>}, {transform_indices = @transform_1, window_bounds = array<i64: 1, 1, 256>}, {transform_indices = @transform_2, window_bounds = array<i64: 1, 3, 256>}]} {
    %c0 = arith.constant 0 : index
    %c0_0 = arith.constant 0 : index
    %c0_1 = arith.constant 0 : index
    %0 = vector.load %arg2[%c0, %c0_0, %c0_1] : memref<1x3x256xf32, #tpu.memory_space<vmem>>, vector<1x3x256xf32>
    %c0_2 = arith.constant 0 : index
    %c0_3 = arith.constant 0 : index
    %c0_4 = arith.constant 0 : index
    %1 = vector.load %arg3[%c0_2, %c0_3, %c0_4] : memref<1x1x256xf32, #tpu.memory_space<vmem>>, vector<1x1x256xf32>
    %cst = arith.constant 1.000000e+00 : f32
    %2 = vector.broadcast %cst : f32 to vector<1x1x256xf32>
    %3 = arith.subf %2, %1 : vector<1x1x256xf32>
    %4 = vector.broadcast %3 : vector<1x1x256xf32> to vector<1x3x256xf32>
    %5 = arith.mulf %0, %4 : vector<1x3x256xf32>
    %6 = vector.broadcast %1 : vector<1x1x256xf32> to vector<1x3x256xf32>
    %7 = arith.addf %5, %6 : vector<1x3x256xf32>
    %c0_5 = arith.constant 0 : index
    %c0_6 = arith.constant 0 : index
    %c0_7 = arith.constant 0 : index
    %8 = vector.load %arg4[%c0_5, %c0_6, %c0_7] : memref<1x3x256xf32, #tpu.memory_space<vmem>>, vector<1x3x256xf32>
    tpu.vector_store %arg4[%c0_5, %c0_6, %c0_7], %7 {strides = array<i32>} : memref<1x3x256xf32, #tpu.memory_space<vmem>>, vector<1x3x256xf32>,
    return
  }
  func.func @transform_0(%arg0: i32, %arg1: i32) -> (i32, i32, i32) {
    %c0_i32 = arith.constant 0 : i32
    %c0_i32_0 = arith.constant 0 : i32
    return %arg0, %c0_i32, %arg1 : i32, i32, i32
  }
  func.func @transform_1(%arg0: i32, %arg1: i32) -> (i32, i32, i32) {
    %c0_i32 = arith.constant 0 : i32
    %c0_i32_0 = arith.constant 0 : i32
    return %arg0, %c0_i32, %arg1 : i32, i32, i32
  }
  func.func @transform_2(%arg0: i32, %arg1: i32) -> (i32, i32, i32) {
    %c0_i32 = arith.constant 0 : i32
    %c0_i32_0 = arith.constant 0 : i32
    return %arg0, %c0_i32, %arg1 : i32, i32, i32
  }
}

</mosaic_0001>

<bundles_post_ra>
// kernel: tpu_custom_call.1
= control target key start
LH: loop header
LB: loop body
LE: loop exit
PB: predicated region body
PF: predicated region fallthrough
CT: control target
= control target key end

     0   :  { %s423_s9 = smov 0   ;;  %s425_s10 = smov 0   ;;  %s459_s0 = inlined_call_operand.vmem [shape: f32[2,3,256], index: 0, kind: input, shape index: {}]   ;;  %s460_s1 = inlined_call_operand.vmem [shape: f32[2,1,256], index: 1, kind: input, shape index: {}]   ;;  %s461_s2 = inlined_call_operand.vmem [shape: f32[2,3,256], index: 2, kind: output, shape index: {}]  }
   0x1   :  { %s427_s11 = smov 0  }
   0x2 LB: > { %s24_s12 = sadd.s32 1, %s402_s10  ;;  %p350_p0 = scmp.ge.s32.totalorder %s406_s11, 1  ;;  %s406_s11 = sphi %s427_s11, %s12_s11   ;;  %s402_s10 = sphi %s425_s10, %s463_s10   ;;  %s398_s9 = sphi %s423_s9, %s462_s9  }
   0x3   : > { %p26_p1 = scmp.ge.s32.totalorder %s24_s12, 2  ;;  %p149_p2 = scmp.lt.s32.totalorder %s406_s11, 3 }
   0x5   : > { %s465_s12 = smov (%p26_p1, %s24_s12), 0  ;;  %p150_p3 = pnand %p350_p0, %p149_p2 }
   0x6   : > { %p188_p4 = scmp.lt.s32.totalorder (!%p150_p3), %s398_s9, 1  ;;  %v220_v0 = vlaneseq (!%p150_p3) }
   0x7   : > { %153 = sbr.rel (%p150_p3) target bundleno = 29 (0x1d), region = 28 }
   0x8   : > { %v221_v1 = vshrl.u32 (!%p150_p3), %v220_v0, 7 }
   0xa   : > { %v222_v2 = vsub.s32 (!%p150_p3), 0, %v221_v1  ;;  %v226_v3 = vsub.s32 (!%p150_p3), 1, %v221_v1 }
   0xe   : > { %s467_s9 = smov (!%p188_p4, %s398_s9), 1 }
   0xf   : > { %s358_s13 = sshll.u32 %s467_s9, 3  ;;  %s353_s14 = sshll.u32 %s467_s9, 1 }
  0x10   : > { %s204_s17 = scalar_lea.vmem %s460_s1, %s353_s14  ;;  %s195_s20 = scalar_lea.vmem %s459_s0, %s358_s13 }
  0x11   : > { %v217_v4 = vld [vmem:[%s204_s17] sm:$0x3]  ;;  %s214_s23 = scalar_lea.vmem %s461_s2, %s358_s13 }
  0x12   : > { %v218_v5 = vsub.f32 1.0, %v217_v4  ;;  %v235_v6 = vrot.slane %v217_v4, %v222_v2  ;;  %v239_v7 = vrot.slane %v217_v4, %v226_v3  ;;  %v216_v10 = vld [vmem:[%s195_s20] sm:$0x77] }
  0x14   : > { %v223_v8 = vrot.slane %v218_v5, %v222_v2  ;;  %v227_v9 = vrot.slane %v218_v5, %v226_v3  ;;  %v240_v12 = vcombine.low %v235_v6, %v239_v7 }
  0x16   : > { %v228_v11 = vcombine.low %v223_v8, %v227_v9 }
  0x18   : > { %v230_v13 = vmul.f32 %v228_v11, %v216_v10 }
  0x1a   : > { %v242_v14 = vadd.f32 %v240_v12, %v230_v13 }
  0x1c   : > { %243 = vst [vmem:[%s214_s23] sm:$0x77] %v242_v14 }
  0x1d PF: > { %s12_s11 = sadd.s32 1, %s406_s11   ;;  %s462_s9 = smov %s402_s10 }
  0x1e   : > { %p9_p5 = scmp.ge.s32.totalorder %s12_s11, 4   ;;  %s463_s10 = smov %s465_s12 }
  0x20   :  { %11 = sbr.rel (!%p9_p5) target bundleno = 2 (0x2), region = 61 }

</bundles_post_ra>
